<compile_context>
chip_gen: v5e
topology: v5e:2x2
jax: 0.10.0
libtpu: 0.0.40
codegen_flags: <defaults>
</compile_context>

<pallas_src>
import functools

import jax
import jax.numpy as jnp
from jax import lax
from jax.experimental import pallas as pl
from jax.experimental.pallas import tpu as pltpu

LANE = 128


def _round_up(x, m):
    return -(-x // m) * m


def _vmem_capacity_bytes():
    """Per-core VMEM capacity; falls back to the v7x-safe 64 MiB."""
    try:
        info = pltpu.get_tpu_info()
        cap = getattr(info, "vmem_capacity_bytes", None)
        if cap:
            return int(cap)
    except Exception:
        pass
    return 64 * 1024 * 1024


# ---------------------------------------------------------------------------
# Kernel: out = replicate_pad(x1) + (W @ replicate_pad(x2) + bias), one slab.
# ---------------------------------------------------------------------------
def _enc_combiner_kernel(w_ref, b_ref, x1_ref, x2_ref, o_ref, *,
                         Wt, W1, W2, Wmax, Bblk, use_vpu_mac):
    # w_ref : (Cout, Cin2) f32   normalized 1x1-conv weight
    # b_ref : (Cout, 1)   f32    bias
    # x1_ref: (Bblk, Cout, Wt)   skip input  (W block index clamped if shorter)
    # x2_ref: (Bblk, Cin2, Wt)   conv input  (W block index clamped if shorter)
    # o_ref : (Bblk, Cout, Wt)
    cin2 = w_ref.shape[1]
    pad1 = W1 < Wmax            # static: x1 is the shorter input
    pad2 = W2 < Wmax            # static: conv(x2) is the shorter one
    l1 = (W1 - 1) % Wt          # last valid column inside the clamped block
    l2 = (W2 - 1) % Wt

    bias = b_ref[...].astype(jnp.float32)                       # (Cout, 1)

    if pad1 or pad2:
        # Global output-column index of every lane of this tile, built ONCE per
        # tile (hoisted out of any batch loop).  For tiles that need no padding
        # the selects below are all-false VPU filler (free in a mem-bound kernel).
        col = (pl.program_id(1) * Wt
               + lax.broadcasted_iota(jnp.int32, (1, 1, Wt), 2))  # (1, 1, Wt)

    if use_vpu_mac:
        # ---- small Cin2: fully vectorized VPU multiply-accumulate ----------
        w = w_ref[...].astype(jnp.float32)                        # (Cout, Cin2)
        x2 = x2_ref[...]                                          # (Bblk, Cin2, Wt)
        # bias folded into the first MAC term.
        conv = w[:, 0:1] * x2[:, 0:1, :].astype(jnp.float32) + bias
        for c in range(1, cin2):
            conv = conv + w[:, c:c + 1] * x2[:, c:c + 1, :].astype(jnp.float32)
        if pad2:                                                  # replicate-pad conv+bias
            conv = jnp.where(col >= W2, conv[:, :, l2:l2 + 1], conv)
        x1 = x1_ref[...].astype(jnp.float32)                      # (Bblk, Cout, Wt)
        if pad1:                                                  # replicate-pad x1
            x1 = jnp.where(col >= W1, x1[:, :, l1:l1 + 1], x1)
        o_ref[...] = (x1 + conv).astype(o_ref.dtype)
    else:
        # ---- larger Cin2: per-batch MXU matmul inside fori_loop ------------
        w = w_ref[...].astype(x2_ref.dtype)                       # cast hoisted
        if pad1 or pad2:
            col2 = col[0]                                         # (1, Wt)

        def body(bi, carry):
            conv = jnp.dot(w, x2_ref[bi],
                           preferred_element_type=jnp.float32) + bias
            if pad2:
                conv = jnp.where(col2 >= W2, conv[:, l2:l2 + 1], conv)
            x1b = x1_ref[bi].astype(jnp.float32)
            if pad1:
                x1b = jnp.where(col2 >= W1, x1b[:, l1:l1 + 1], x1b)
            o_ref[bi] = (x1b + conv).astype(o_ref.dtype)
            return carry

        lax.fori_loop(0, Bblk, body, None, unroll=(Bblk <= 4))


# ---------------------------------------------------------------------------
# pallas_call wrapper
# ---------------------------------------------------------------------------
def enc_combiner_pallas(x1, x2, w_norm, bias):
    """x1: (B, Cout, W1), x2: (B, Cin2, W2), w_norm: (Cout, Cin2), bias: (Cout,)."""
    B, Cout, W1 = x1.shape
    B2, Cin2, W2 = x2.shape
    assert B == B2 and w_norm.shape == (Cout, Cin2) and bias.shape == (Cout,)
    Wmax = max(W1, W2)

    # ---- generation-aware VMEM budget -----------------------------------
    vmem_cap = _vmem_capacity_bytes()
    vmem_limit = (vmem_cap * 3) // 4          # 96 MiB on v5e/v6e, 48 MiB on v7x
    budget = vmem_limit // 4                  # single-buffered slab bytes

    # ---- block sizing: lane-dense W tile + batch chunk -------------------
    sz1 = jnp.dtype(x1.dtype).itemsize
    sz2 = jnp.dtype(x2.dtype).itemsize
    per_col = 2 * Cout * sz1 + Cin2 * sz2     # x1 + out + x2 bytes per column
    Wt = min(_round_up(Wmax, LANE), 2048)
    while Wt > LANE and per_col * Wt > budget:
        Wt -= LANE
    Bblk = max(1, min(B, 32, budget // max(1, per_col * Wt)))
    nW = pl.cdiv(Wmax, Wt)
    nB = pl.cdiv(B, Bblk)
    # Guarantee >= 2 grid steps so both v7x TensorCores get work
    # (costs only ~0.35 us of per-step overhead on single-core chips).
    if nB * nW < 2:
        if B >= 2:
            Bblk = (B + 1) // 2
            nB = pl.cdiv(B, Bblk)
        elif Wt > LANE and Wmax > LANE:
            Wt = _round_up(pl.cdiv(Wmax, 2), LANE)
            nW = pl.cdiv(Wmax, Wt)

    lb1 = (W1 - 1) // Wt            # last W block holding valid x1 data
    lb2 = (W2 - 1) // Wt

    def in_map(lb):
        if lb < nW - 1:             # shorter input: clamp its W block index
            return lambda b, w: (b, 0, jnp.minimum(w, lb))
        return lambda b, w: (b, 0, w)

    kernel = functools.partial(
        _enc_combiner_kernel, Wt=Wt, W1=W1, W2=W2, Wmax=Wmax, Bblk=Bblk,
        use_vpu_mac=(Cin2 <= 8))

    return pl.pallas_call(
        kernel,
        out_shape=jax.ShapeDtypeStruct((B, Cout, Wmax), x1.dtype),
        grid_spec=pltpu.PrefetchScalarGridSpec(
            num_scalar_prefetch=0,
            grid=(nB, nW),          # W innermost -> clamped-block DMA elision
            in_specs=[
                pl.BlockSpec((Cout, Cin2), lambda b, w: (0, 0)),   # weight
                pl.BlockSpec((Cout, 1), lambda b, w: (0, 0)),      # bias
                pl.BlockSpec((Bblk, Cout, Wt), in_map(lb1)),       # x1 block
                pl.BlockSpec((Bblk, Cin2, Wt), in_map(lb2)),       # x2 block
            ],
            out_specs=pl.BlockSpec((Bblk, Cout, Wt), lambda b, w: (b, 0, w)),
        ),
        compiler_params=pltpu.CompilerParams(
            dimension_semantics=("parallel", "parallel"),
            vmem_limit_bytes=int(vmem_limit)),
    )(w_norm.astype(jnp.float32), bias.reshape(Cout, 1).astype(jnp.float32),
      x1, x2)


# ---------------------------------------------------------------------------
# Module-equivalent parameter setup / forward (plain-JAX glue is tiny)
# ---------------------------------------------------------------------------
def make_enc_combiner_params(key, Cin2, Cout):
    """Deterministic synthetic parameters matching Conv1D.__init__ shapes."""
    kw, kb = jax.random.split(key)
    # PyTorch Conv1d weight: (Cout, Cin2, kernel_size=1); bias: (Cout,)
    weight = jax.random.normal(kw, (Cout, Cin2, 1), dtype=jnp.float32) * 0.1
    bias = jax.random.normal(kb, (Cout,), dtype=jnp.float32) * 0.1
    wn_init = jnp.sqrt(jnp.sum(weight * weight, axis=(1, 2)))     # (Cout,)
    log_weight_norm = jnp.log(wn_init + 0.01).reshape(Cout, 1, 1)
    return {"weight": weight, "bias": bias, "log_weight_norm": log_weight_norm}


def normalize_weight(log_weight_norm, weight):
    """normalize_weight_jit equivalent (tiny: Cout*Cin2 elements)."""
    n = jnp.exp(log_weight_norm)                                  # (Cout,1,1)
    wn = jnp.sqrt(jnp.sum(weight * weight, axis=(1, 2)))          # (Cout,)
    return n * weight / (wn.reshape(-1, 1, 1) + 1e-05)            # (Cout,Cin2,1)


def enc_combiner_forward(params, x1, x2):
    """EncCombinerCell.forward: x2 = conv1x1(x2); replicate-pad; out = x1 + x2."""
    # TODO(synk): Conv1D data_init path (distributed average_tensor init) is a
    # training-time side effect, not part of the inference forward; omitted.
    w_norm = normalize_weight(params["log_weight_norm"], params["weight"])
    return enc_combiner_pallas(x1, x2, w_norm[:, :, 0], params["bias"])


# ---------------------------------------------------------------------------
def _reference_forward(params, x1, x2):
    """Pure-JAX reference mirroring the PyTorch forward exactly."""
    w_norm = normalize_weight(params["log_weight_norm"], params["weight"])
    conv = jnp.einsum("oc,bcw->bow", w_norm[:, :, 0], x2,
                      precision=lax.Precision.HIGHEST)
    conv = conv + params["bias"][None, :, None]
    W1, W2 = x1.shape[2], conv.shape[2]
    if W1 < W2:
        x1 = jnp.pad(x1, ((0, 0), (0, 0), (0, W2 - W1)), mode="edge")
    elif W2 < W1:
        conv = jnp.pad(conv, ((0, 0), (0, 0), (0, W1 - W2)), mode="edge")
    return x1 + conv


if __name__ == "__main__":
    key = jax.random.PRNGKey(0)
    configs = [
        # (B, Cin2, Cout, W1, W2)
        (2, 4, 8, 96, 128),       # x1 shorter -> fused replicate-pad of x1 (VPU path)
        (2, 4, 8, 128, 96),       # x2 shorter -> fused replicate-pad of conv (VPU path)
        (3, 4, 4, 96, 160),       # non-divisible batch -> masked partial block
        (2, 16, 16, 100, 1300),   # MXU path, x1 much shorter
        (2, 16, 16, 2500, 1800),  # MXU path, multi W-tile grid, clamped x2 blocks
    ]
    for idx, (B, Cin2, Cout, W1, W2) in enumerate(configs):
        kp, kx1, kx2, key = jax.random.split(key, 4)
        params = make_enc_combiner_params(kp, Cin2, Cout)
        x1 = jax.random.normal(kx1, (B, Cout, W1), dtype=jnp.float32)
        x2 = jax.random.normal(kx2, (B, Cin2, W2), dtype=jnp.float32)

        out = jax.block_until_ready(enc_combiner_forward(params, x1, x2))
        ref = _reference_forward(params, x1, x2)

        assert out.shape == ref.shape == (B, Cout, max(W1, W2)), f"shape mismatch {idx}"
        # The MXU path's f32 matmul may run at the TPU default (bf16-pass)
        # matmul precision, so allow a looser tolerance there than on the
        # exact-f32 VPU-MAC path.
        tol = 1e-4 if Cin2 <= 8 else 2e-2
        err = float(jnp.max(jnp.abs(out - ref)))
        assert jnp.allclose(out, ref, atol=tol, rtol=tol), \
            f"value mismatch cfg {idx}: max abs err {err}"

    print("KERNEL_OK")
</pallas_src>

<mosaic_0001>
module attributes {stable_mosaic.version = 11 : i64} {
  func.func @_enc_combiner_kernel(%arg0: i32, %arg1: i32, %arg2: memref<8x4xf32, #tpu.memory_space<vmem>>, %arg3: memref<8x1xf32, #tpu.memory_space<vmem>>, %arg4: memref<1x8x128xf32, #tpu.memory_space<vmem>>, %arg5: memref<1x4x128xf32, #tpu.memory_space<vmem>>, %arg6: memref<1x8x128xf32, #tpu.memory_space<vmem>>) attributes {dimension_semantics = [#tpu.dimension_semantics<parallel>, #tpu.dimension_semantics<parallel>], iteration_bounds = array<i64: 2, 1>, scalar_prefetch = 0 : i64, scratch_operands = 0 : i64, tpu.core_type = #tpu.core_type<tc>, window_params = [{pipeline_mode = #tpu.pipeline_mode<synchronous>, transform_indices = @transform_0, window_bounds = array<i64: 8, 4>}, {pipeline_mode = #tpu.pipeline_mode<synchronous>, transform_indices = @transform_1, window_bounds = array<i64: 8, 1>}, {transform_indices = @transform_2, window_bounds = array<i64: 1, 8, 128>}, {transform_indices = @transform_3, window_bounds = array<i64: 1, 4, 128>}, {transform_indices = @transform_4, window_bounds = array<i64: 1, 8, 128>}]} {
    %c0 = arith.constant 0 : index
    %c0_0 = arith.constant 0 : index
    %0 = vector.load %arg3[%c0, %c0_0] : memref<8x1xf32, #tpu.memory_space<vmem>>, vector<8x1xf32>
    %c128_i32 = arith.constant 128 : i32
    %1 = arith.muli %arg1, %c128_i32 : i32
    %2 = tpu.iota {dimensions = array<i32: 2>} : vector<1x1x128xi32>
    %3 = vector.broadcast %1 : i32 to vector<1x1x128xi32>
    %4 = arith.addi %3, %2 : vector<1x1x128xi32>
    %c0_1 = arith.constant 0 : index
    %c0_2 = arith.constant 0 : index
    %5 = vector.load %arg2[%c0_1, %c0_2] : memref<8x4xf32, #tpu.memory_space<vmem>>, vector<8x4xf32>
    %c0_3 = arith.constant 0 : index
    %c0_4 = arith.constant 0 : index
    %c0_5 = arith.constant 0 : index
    %6 = vector.load %arg5[%c0_3, %c0_4, %c0_5] : memref<1x4x128xf32, #tpu.memory_space<vmem>>, vector<1x4x128xf32>
    %7 = vector.extract_strided_slice %5 {offsets = [0, 0], sizes = [8, 1], strides = [1, 1]} : vector<8x4xf32> to vector<8x1xf32>
    %8 = vector.extract_strided_slice %6 {offsets = [0, 0, 0], sizes = [1, 1, 128], strides = [1, 1, 1]} : vector<1x4x128xf32> to vector<1x1x128xf32>
    %9 = vector.shape_cast %7 : vector<8x1xf32> to vector<1x8x1xf32>
    %10 = vector.broadcast %9 : vector<1x8x1xf32> to vector<1x8x128xf32>
    %11 = vector.broadcast %8 : vector<1x1x128xf32> to vector<1x8x128xf32>
    %12 = arith.mulf %10, %11 : vector<1x8x128xf32>
    %13 = vector.shape_cast %0 : vector<8x1xf32> to vector<1x8x1xf32>
    %14 = vector.broadcast %13 : vector<1x8x1xf32> to vector<1x8x128xf32>
    %15 = arith.addf %12, %14 : vector<1x8x128xf32>
    %16 = vector.extract_strided_slice %5 {offsets = [0, 1], sizes = [8, 1], strides = [1, 1]} : vector<8x4xf32> to vector<8x1xf32>
    %17 = vector.extract_strided_slice %6 {offsets = [0, 1, 0], sizes = [1, 1, 128], strides = [1, 1, 1]} : vector<1x4x128xf32> to vector<1x1x128xf32>
    %18 = vector.shape_cast %16 : vector<8x1xf32> to vector<1x8x1xf32>
    %19 = vector.broadcast %18 : vector<1x8x1xf32> to vector<1x8x128xf32>
    %20 = vector.broadcast %17 : vector<1x1x128xf32> to vector<1x8x128xf32>
    %21 = arith.mulf %19, %20 : vector<1x8x128xf32>
    %22 = arith.addf %15, %21 : vector<1x8x128xf32>
    %23 = vector.extract_strided_slice %5 {offsets = [0, 2], sizes = [8, 1], strides = [1, 1]} : vector<8x4xf32> to vector<8x1xf32>
    %24 = vector.extract_strided_slice %6 {offsets = [0, 2, 0], sizes = [1, 1, 128], strides = [1, 1, 1]} : vector<1x4x128xf32> to vector<1x1x128xf32>
    %25 = vector.shape_cast %23 : vector<8x1xf32> to vector<1x8x1xf32>
    %26 = vector.broadcast %25 : vector<1x8x1xf32> to vector<1x8x128xf32>
    %27 = vector.broadcast %24 : vector<1x1x128xf32> to vector<1x8x128xf32>
    %28 = arith.mulf %26, %27 : vector<1x8x128xf32>
    %29 = arith.addf %22, %28 : vector<1x8x128xf32>
    %30 = vector.extract_strided_slice %5 {offsets = [0, 3], sizes = [8, 1], strides = [1, 1]} : vector<8x4xf32> to vector<8x1xf32>
    %31 = vector.extract_strided_slice %6 {offsets = [0, 3, 0], sizes = [1, 1, 128], strides = [1, 1, 1]} : vector<1x4x128xf32> to vector<1x1x128xf32>
    %32 = vector.shape_cast %30 : vector<8x1xf32> to vector<1x8x1xf32>
    %33 = vector.broadcast %32 : vector<1x8x1xf32> to vector<1x8x128xf32>
    %34 = vector.broadcast %31 : vector<1x1x128xf32> to vector<1x8x128xf32>
    %35 = arith.mulf %33, %34 : vector<1x8x128xf32>
    %36 = arith.addf %29, %35 : vector<1x8x128xf32>
    %c0_6 = arith.constant 0 : index
    %c0_7 = arith.constant 0 : index
    %c0_8 = arith.constant 0 : index
    %37 = vector.load %arg4[%c0_6, %c0_7, %c0_8] : memref<1x8x128xf32, #tpu.memory_space<vmem>>, vector<1x8x128xf32>
    %c96_i32 = arith.constant 96 : i32
    %38 = vector.broadcast %c96_i32 : i32 to vector<1x1x128xi32>
    %39 = arith.cmpi sge, %4, %38 : vector<1x1x128xi32>
    %40 = vector.extract_strided_slice %37 {offsets = [0, 0, 95], sizes = [1, 8, 1], strides = [1, 1, 1]} : vector<1x8x128xf32> to vector<1x8x1xf32>
    %41 = vector.shape_cast %39 : vector<1x1x128xi1> to vector<1x1x128xi1>
    %42 = vector.broadcast %41 : vector<1x1x128xi1> to vector<1x8x128xi1>
    %43 = vector.shape_cast %40 : vector<1x8x1xf32> to vector<1x8x1xf32>
    %44 = vector.broadcast %43 : vector<1x8x1xf32> to vector<1x8x128xf32>
    %45 = arith.select %42, %44, %37 : vector<1x8x128xi1>, vector<1x8x128xf32>
    %46 = arith.addf %45, %36 : vector<1x8x128xf32>
    %c0_9 = arith.constant 0 : index
    %c0_10 = arith.constant 0 : index
    %c0_11 = arith.constant 0 : index
    %47 = vector.load %arg6[%c0_9, %c0_10, %c0_11] : memref<1x8x128xf32, #tpu.memory_space<vmem>>, vector<1x8x128xf32>
    tpu.vector_store %arg6[%c0_9, %c0_10, %c0_11], %46 {strides = array<i32>} : memref<1x8x128xf32, #tpu.memory_space<vmem>>, vector<1x8x128xf32>,
    return
  }
  func.func @transform_0(%arg0: i32, %arg1: i32) -> (i32, i32) {
    %c0_i32 = arith.constant 0 : i32
    %c0_i32_0 = arith.constant 0 : i32
    %c0_i32_1 = arith.constant 0 : i32
    return %c0_i32, %c0_i32_0 : i32, i32
  }
  func.func @transform_1(%arg0: i32, %arg1: i32) -> (i32, i32) {
    %c0_i32 = arith.constant 0 : i32
    %c0_i32_0 = arith.constant 0 : i32
    %c0_i32_1 = arith.constant 0 : i32
    return %c0_i32, %c0_i32_0 : i32, i32
  }
  func.func @transform_2(%arg0: i32, %arg1: i32) -> (i32, i32, i32) {
    %c0_i32 = arith.constant 0 : i32
    %c0_i32_0 = arith.constant 0 : i32
    return %arg0, %c0_i32, %arg1 : i32, i32, i32
  }
  func.func @transform_3(%arg0: i32, %arg1: i32) -> (i32, i32, i32) {
    %c0_i32 = arith.constant 0 : i32
    %c0_i32_0 = arith.constant 0 : i32
    return %arg0, %c0_i32, %arg1 : i32, i32, i32
  }
  func.func @transform_4(%arg0: i32, %arg1: i32) -> (i32, i32, i32) {
    %c0_i32 = arith.constant 0 : i32
    %c0_i32_0 = arith.constant 0 : i32
    return %arg0, %c0_i32, %arg1 : i32, i32, i32
  }
}

</mosaic_0001>

<bundles_post_ra>
// kernel: tpu_custom_call.1
= control target key start
LH: loop header
LB: loop body
LE: loop exit
PB: predicated region body
PF: predicated region fallthrough
CT: control target
= control target key end

     0   :  { %9 = vsyncpa [#allocation3], 0  ;;  %s789_s0 = inlined_call_operand.vmem [shape: f32[8,4], index: 0, kind: input, shape index: {}]   ;;  %s790_s1 = inlined_call_operand.vmem [shape: f32[8,1], index: 1, kind: input, shape index: {}]   ;;  %s791_s2 = inlined_call_operand.vmem [shape: f32[2,8,96], index: 2, kind: input, shape index: {}]   ;;  %s792_s3 = inlined_call_operand.hbm [shape: f32[2,4,128], index: 3, kind: input, shape index: {}]   ;;  %s793_s4 = inlined_call_operand.hbm [shape: f32[2,8,128], index: 4, kind: output, shape index: {}]  }
   0x1   :  { %11 = vsyncpa [#allocation3 + $0x1], 0 }
   0x2   :  { %12 = vsyncpa [#allocation4], 0 }
   0x3   :  { %14 = vsyncpa [#allocation4 + $0x1], 0  ;;  %s657_s15 = smov 0   ;;  %s659_s16 = smov 0  }
   0x4   :  { %s661_s17 = smov 0   ;;  %s663_s18 = smov 0  }
   0x5   :  { %s665_s19 = smov 0   ;;  %s667_s20 = smov 0  }
   0x6 LB: > { %s426_s21 = sadd.s32 4294967295, %s625_s20   ;;  %s427_s22 = sadd.s32 4294967294, %s625_s20   ;;  %s625_s20 = sphi %s667_s20, %s20_s20   ;;  %s621_s19 = sphi %s665_s19, %s802_s19   ;;  %s617_s18 = sphi %s663_s18, %s801_s18   ;;  %s613_s17 = sphi %s661_s17, %s800_s17   ;;  %s609_s16 = sphi %s659_s16, %s799_s16   ;;  %s605_s15 = sphi %s657_s15, %s798_s15  }
   0x7   : > { %s32_s23 = sadd.s32 1, %s621_s19  ;;  %s111_s24 = sadd.s32 1, %s613_s17 }
   0x8   : > { %p34_p0 = scmp.ge.s32.totalorder %s32_s23, 2  ;;  %p118_p1 = scmp.ne.s32.totalorder %s613_s17, %s609_s16 }
   0x9   : > { %p119_p2 = scmp.eq.s32.totalorder %s625_s20, 0  ;;  %p124_p3 = scmp.ne.s32.totalorder %s609_s16, %s605_s15 }
   0xa   : > { %s804_s23 = smov (%p34_p0, %s32_s23), 0  ;;  %p125_p5 = scmp.eq.s32.totalorder %s426_s21, 0 }
   0xb   : > { %p698_p4 = por %p119_p2, %p118_p1  ;;  %s106_s26 = ssub.s32 %s621_s19, %s804_s23 }
   0xc   : > { %p150_p6 = scmp.eq.s32.totalorder %s426_s21, 1  ;;  %p109_p7 = scmp.eq.s32.totalorder %s106_s26, 0 }
   0xd   : > { %p704_p8 = por %p125_p5, %p124_p3  ;;  %p156_p10 = scmp.eq.s32.totalorder %s427_s22, 1 }
   0xe   : > { %p708_p9 = por %p150_p6, %p118_p1  ;;  %p429_p12 = scmp.ge.s32.totalorder %s625_s20, 2 }
   0xf   : > { %s713_s29 = scalar_select %p109_p7, %s613_s17, %s111_s24  }
  0x10   : > { %p715_p11 = por %p156_p10, %p124_p3  ;;  %p452_p13 = scmp.lt.s32.totalorder %s625_s20, 2 }
  0x11   : > { %s192_s5 = sand.u32 1, %s613_s17   ;;  %s431_s7 = sshll.u32 %s621_s19, 2 }
  0x12   : > { %s430_s6 = sshll.u32 %s192_s5, 2  ;;  %s201_s10 = scalar_lea.hbm %s792_s3, %s431_s7 }
  0x13   : > { %s196_s11 = scalar_lea.vmem [#allocation2], %s430_s6  ;;  %s203_s13 = sshll.u32 %s201_s10, 4  ;;  %s204_s13 = int_to_ptr.hbm [resolvable:$true] %s203_s13 }
  0x14   : > { %s205_s12 = sshll.u32 %s196_s11, 4  ;;  %p445_p0 = pnand %p452_p13, %p698_p4  ;;  %s206_s12 = int_to_ptr.vmem [resolvable:$true] %s205_s12 }
  0x15   : > { %p432_p1 = scmp.ge.s32.totalorder %s625_s20, 1  ;;  %p210_p2 = scmp.lt.s32.totalorder %s625_s20, 3 }
  0x16   : > { %s193_s14 = scalar_lea.sflag [#allocation3], %s192_s5 }
  0x17   : > { %447 = dma.hbm_to_vmem [thread:$0]  (!%p445_p0), %s204_s13, 64, %s206_s12, %s193_s14  }
  0x18   : > { %p211_p3 = pnand %p432_p1, %p210_p2 }
  0x19   : > { %s731_s21 = sand.u32 (!%p211_p3), 1, %s609_s16  }
  0x1a   : > { %214 = sbr.rel (%p211_p3) target bundleno = 170 (0xaa), region = 36  ;;  %s433_s22 = sshll.u32 (!%p211_p3), %s731_s21, 2 }
  0x1b   : > { %s217_s24 = scalar_lea.sflag (!%p211_p3), [#allocation3], %s731_s21  ;;  %s220_s26 = scalar_lea.vmem (!%p211_p3), [#allocation2], %s433_s22 }
  0x1f   : > { %596 = dma.done.wait (%p704_p8), %s217_s24, 64  }
  0x20   : > { %598 = vsyncadd (%p704_p8), %s217_s24, 4294967232  ;;  %v627_v0 = vmov 0   ;;  %v628_v1 = vmov 1   ;;  %p253_p4 = scmp.lt.s32.totalorder %s617_s18, 1  ;;  %v629_v2 = vmov 3   ;;  %v266_v3 = vld [vmem:[%s789_s0] sm:$0xff]  ;;  %v262_v13 = vlaneseq }
  0x21   : > { %507 = vset.pattern.permute.xlu0 %v627_v0  ;;  %508 = vset.pattern.permute.xlu1 %v628_v1  ;;  %v260_v4 = vld [vmem:[%s790_s1] sm:$0xff]  ;;  %v630_v6 = vmov 2   ;;  %v631_v7 = vmov 95   ;;  %s434_s12 = sshll.u32 %s731_s21, 3  ;;  %s437_s13 = sshll.u32 %s617_s18, 3 }
  0x22   : > { %510 = vset.pattern.permute.xlu2 %v629_v2  ;;  %s254_s25 = scalar_select %p253_p4, %s617_s18, 1  ;;  %270 = vperm.xlu0 %507, %v266_v3   ;;  %v267_v8 = vld [vmem:[%s220_s26] sm:$0xf]  ;;  %v263_v17 = vand.u32 127, %v262_v13 }
  0x23   : > { %282 = vperm.xlu1 %508, %v266_v3   ;;  %296 = vperm.xlu2 %510, %v266_v3   ;;  %v273_v12 = vperm.slane %v267_v8, 0  ;;  %v285_v14 = vperm.slane %v267_v8, 1  ;;  %v292_v15 = vperm.slane %v267_v8, 2  ;;  %v299_v20 = vperm.slane %v267_v8, 3  ;;  %s326_s24 = scalar_lea.hbm %s793_s4, %s437_s13  ;;  %s252_s26 = scalar_lea.vmem [#allocation5], %s434_s12 }
  0x24   : > { %s435_s7 = sshll.u32 %s254_s25, 3  ;;  %vm303_vm0 = vcmp.ge.s32.totalorder %v263_v17, 96  ;;  %s328_s25 = sshll.u32 %s252_s26, 4  ;;  %s329_s25 = int_to_ptr.vmem [resolvable:$true] %s328_s25 }
  0x25   : > { %s259_s9 = scalar_lea.vmem %s791_s2, %s435_s7  ;;  %s330_s18 = sshll.u32 %s326_s24, 4  ;;  %s331_s18 = int_to_ptr.hbm [resolvable:$true] %s330_s18 }
  0x26   : > { %v302_v5 = vld [vmem:[%s259_s9] sm:$0xff]  ;;  %s315_s5 = scalar_lea.sflag [#allocation4], %s731_s21  ;;  %s557_s6 = sshra.s32 %s331_s18, 4  ;;  %s558_s6 = int_to_ptr.hbm [resolvable:$true] %s557_s6 }
  0x27   : > { %s559_s7 = scalar_lea.hbm %s558_s6, 8  ;;  %s563_s9 = scalar_lea.hbm %s793_s4, 16 }
  0x28   : > { %p560_p5 = scmp.ne.s32.totalorder %s558_s6, %s559_s7  ;;  %p564_p8 = scmp.lt.s32.totalorder %s558_s6, %s793_s4 }
  0x29   : > { %p565_p10 = scmp.lt.s32.totalorder %s563_s9, %s559_s7 }
  0x2a   : > { %277 = vperm.xlu0 %507, %v260_v4   ;;  %p561_p6 = pnand %p560_p5, %p708_p9 }
  0x2b   : > { %509 = vset.pattern.permute.xlu1 %v630_v6  ;;  %511 = vset.pattern.permute.xlu2 %v631_v7  ;;  %p566_p13 = por %p565_p10, %p564_p8 }
  0x2c   : > { %289 = vperm.xlu1 %509, %v266_v3   ;;  %308 = vperm.xlu2 %511, %v302_v5   ;;  %p562_p7 = pneg %p561_p6 }
  0x2e   : > { %p567_p0 = pnand %p566_p13, %p562_p7 }
  0x32   : > { %512 = vset.pattern.permute.xlu0 %v631_v7 }
  0x7d   : > { %v297_v11 = vpop.permute.xlu2 %296 }
  0x7e   : > { %v300_v26 = vmul.f32 %v299_v20, %v297_v11 }
  0x86   : > { %v309_v25 = vpop.permute.xlu2 %308 }
  0x87   : > { %v311_v28 = vsel %vm303_vm0, %v309_v25, %v302_v5 }
  0x94   : > { %v271_v9 = vpop.permute.xlu0 %270 }
  0x95   : > { %v283_v10 = vpop.permute.xlu1 %282  ;;  %v274_v16 = vmul.f32 %v273_v12, %v271_v9 }
  0x96   : > { %v286_v19 = vmul.f32 %v285_v14, %v283_v10 }
  0x9c   : > { %v278_v18 = vpop.permute.xlu0 %277 }
  0x9d   : > { %v280_v21 = vadd.f32 %v278_v18, %v274_v16 }
  0x9e   : > { %v290_v22 = vpop.permute.xlu1 %289 }
  0x9f   : > { %v293_v23 = vmul.f32 %v292_v15, %v290_v22  ;;  %v287_v24 = vadd.f32 %v286_v19, %v280_v21 }
  0xa1   : > { %v294_v27 = vadd.f32 %v293_v23, %v287_v24 }
  0xa3   : > { %v301_v29 = vadd.f32 %v300_v26, %v294_v27 }
  0xa5   : > { %v312_v30 = vadd.f32 %v311_v28, %v301_v29 }
  0xa7   : > { %313 = vst [vmem:[%s252_s26] sm:$0xff] %v312_v30 }
  0xa8   : > { %570 = shalt.err (!%p567_p0)
}
  0xa9   : > { %442 = dma.vmem_to_hbm [thread:$0]  (%p708_p9), %s329_s25, 128, %s331_s18, %s315_s5  }
  0xaa PF: > { %s342_s21 = sand.u32 1, %s605_s15   ;;  %p449_p1 = pnand %p429_p12, %p715_p11 }
  0xab   : > { %s343_s12 = scalar_lea.sflag [#allocation4], %s342_s21 }
  0xac   : > { %p450_p2 = pneg %p449_p1 }
  0xae   : > { %600 = dma.done.wait (%p450_p2), %s343_s12, 128  }
  0xaf   : > { %602 = vsyncadd (%p450_p2), %s343_s12, 4294967168  ;;  %s20_s20 = sadd.s32 1, %s625_s20   ;;  %s798_s15 = smov %s609_s16 }
  0xb0   : > { %p17_p3 = scmp.ge.s32.totalorder %s20_s20, 4   ;;  %s799_s16 = smov %s613_s17 }
  0xb1   : > { %s800_s17 = smov %s713_s29  ;;  %s801_s18 = smov %s621_s19 }
  0xb2   : > { %s802_s19 = smov %s804_s23  ;;  %19 = sbr.rel (!%p17_p3) target bundleno = 6 (0x6), region = 84 }
  0xb7   :  { %349 = vsyncpa [#allocation3], 1 }
  0xb8   :  { %351 = vsyncpa [#allocation3 + $0x1], 1 }
  0xb9   :  { %352 = vsyncpa [#allocation4], 1 }
  0xba   :  { %354 = vsyncpa [#allocation4 + $0x1], 1 }

</bundles_post_ra>
